<compile_context>
chip_gen: v7x
topology: tpu7x:2x2x1
jax: 0.10.0
libtpu: 0.0.40
codegen_flags: <defaults>
</compile_context>

<pallas_src>
import jax
import jax.numpy as jnp
from jax import lax
from jax.experimental import pallas as pl
from jax.experimental.pallas import tpu as pltpu


def _conv_im2col_kernel(p_ref, w_ref, o_ref):
    # p_ref: (1, 9*C_in, H*W)  bf16 im2col patches for one batch element
    # w_ref: (C_out, 9*C_in)   bf16 reshaped conv weight
    # o_ref: (1, C_out, H*W)   output in flattened-NCHW layout (lane-dense)
    acc = jnp.dot(w_ref[...], p_ref[0], preferred_element_type=jnp.float32)
    o_ref[0] = acc.astype(o_ref.dtype)


def conv_model_forward(x_nchw, weight_oihw):
    """Conv2d(k=3, pad=1, bias=False) followed by flatten (NCHW order)."""
    N, C_in, H, W = x_nchw.shape
    C_out = weight_oihw.shape[0]
    HW = H * W

    # --- JAX glue: im2col (pure layout work, no math) ---------------------
    x_pad = jnp.pad(x_nchw, ((0, 0), (0, 0), (1, 1), (1, 1)))   # (N, C_in, H+2, W+2)
    taps = []
    for kh in range(3):
        for kw in range(3):
            taps.append(x_pad[:, :, kh:kh + H, kw:kw + W].reshape(N, C_in, HW))
    # tap-major, channel-minor along axis 1: column = (kh*3 + kw)*C_in + c
    patches = jnp.concatenate(taps, axis=1)                      # (N, 9*C_in, HW)

    # weight (C_out, C_in, kh, kw) -> (C_out, kh, kw, C_in) -> (C_out, 9*C_in)
    # to match the patch column ordering above.
    w2d = jnp.transpose(weight_oihw, (0, 2, 3, 1)).reshape(C_out, 9 * C_in)

    # bf16 operands for the MXU; accumulation stays f32 inside the kernel.
    patches = patches.astype(jnp.bfloat16)
    w2d = w2d.astype(jnp.bfloat16)

    out = pl.pallas_call(
        _conv_im2col_kernel,
        out_shape=jax.ShapeDtypeStruct((N, C_out, HW), x_nchw.dtype),
        grid_spec=pltpu.PrefetchScalarGridSpec(
            num_scalar_prefetch=0,
            grid=(N,),
            in_specs=[
                pl.BlockSpec((1, 9 * C_in, HW), lambda n: (n, 0, 0)),
                pl.BlockSpec((C_out, 9 * C_in), lambda n: (0, 0)),
            ],
            out_specs=pl.BlockSpec((1, C_out, HW), lambda n: (n, 0, 0)),
        ),
        compiler_params=pltpu.CompilerParams(
            dimension_semantics=("parallel",),
        ),
    )(patches, w2d)

    # (N, C_out, H*W) is already flattened-NCHW order -> flatten is free.
    return out.reshape(-1)


if __name__ == "__main__":
    # Small shapes consistent with the module: batch=2, c_in=4, c_out=8, spatial=16.
    N, C_IN, C_OUT, H, W = 2, 4, 8, 16, 16

    key = jax.random.PRNGKey(0)
    kx, kw = jax.random.split(key)
    x = jax.random.normal(kx, (N, C_IN, H, W), dtype=jnp.float32)
    # Deterministic "Kaiming-ish" init for conv weight (C_out, C_in, 3, 3).
    fan_in = C_IN * 3 * 3
    weight = jax.random.normal(kw, (C_OUT, C_IN, 3, 3), dtype=jnp.float32) * (fan_in ** -0.5)

    out = conv_model_forward(x, weight)
    out = jax.block_until_ready(out)

    # Reference with the same bf16-truncated operands (kernel uses bf16 x bf16
    # -> f32 accumulation per the perf review), computed via XLA's conv.
    x_q = x.astype(jnp.bfloat16).astype(jnp.float32)
    w_q = weight.astype(jnp.bfloat16).astype(jnp.float32)
    ref = lax.conv_general_dilated(
        x_q, w_q, window_strides=(1, 1), padding=((1, 1), (1, 1)),
        dimension_numbers=("NCHW", "OIHW", "NCHW"),
    ).reshape(-1)

    assert out.shape == (N * C_OUT * H * W,)
    assert jnp.allclose(out, ref, atol=1e-2, rtol=1e-2)

    print("KERNEL_OK")
</pallas_src>

<mosaic_0001>
module attributes {stable_mosaic.version = 11 : i64} {
  func.func @_conv_im2col_kernel(%arg0: i32, %arg1: memref<1x36x256xbf16, #tpu.memory_space<vmem>>, %arg2: memref<8x36xbf16, #tpu.memory_space<vmem>>, %arg3: memref<1x8x256xf32, #tpu.memory_space<vmem>>) attributes {dimension_semantics = [#tpu.dimension_semantics<parallel>], iteration_bounds = array<i64: 2>, scalar_prefetch = 0 : i64, scratch_operands = 0 : i64, tpu.core_type = #tpu.core_type<tc>, window_params = [{transform_indices = @transform_0, window_bounds = array<i64: 1, 36, 256>}, {pipeline_mode = #tpu.pipeline_mode<synchronous>, transform_indices = @transform_1, window_bounds = array<i64: 8, 36>}, {transform_indices = @transform_2, window_bounds = array<i64: 1, 8, 256>}]} {
    %c0 = arith.constant 0 : index
    %c0_0 = arith.constant 0 : index
    %0 = vector.load %arg2[%c0, %c0_0] : memref<8x36xbf16, #tpu.memory_space<vmem>>, vector<8x36xbf16>
    %c0_1 = arith.constant 0 : index
    %c0_2 = arith.constant 0 : index
    %c0_3 = arith.constant 0 : index
    %1 = vector.load %arg1[%c0_1, %c0_2, %c0_3] : memref<1x36x256xbf16, #tpu.memory_space<vmem>>, vector<1x36x256xbf16>
    %2 = vector.shape_cast %1 : vector<1x36x256xbf16> to vector<36x256xbf16>
    %cst = arith.constant dense<0.000000e+00> : vector<8x256xf32>
    %3 = tpu.matmul %0, %2, %cst {dimension_numbers = #tpu.dot_dimension_numbers<[1], [0], [0], [1], [0, 0, 1, 1], [], []>} : vector<8x36xbf16>, vector<36x256xbf16>, vector<8x256xf32> -> vector<8x256xf32>
    %c0_4 = arith.constant 0 : index
    %c0_5 = arith.constant 0 : index
    %c0_6 = arith.constant 0 : index
    %4 = vector.load %arg3[%c0_4, %c0_5, %c0_6] : memref<1x8x256xf32, #tpu.memory_space<vmem>>, vector<1x8x256xf32>
    %5 = vector.shape_cast %4 : vector<1x8x256xf32> to vector<8x256xf32>
    %6 = vector.shape_cast %3 : vector<8x256xf32> to vector<1x8x256xf32>
    tpu.vector_store %arg3[%c0_4, %c0_5, %c0_6], %6 {strides = array<i32>} : memref<1x8x256xf32, #tpu.memory_space<vmem>>, vector<1x8x256xf32>,
    return
  }
  func.func @transform_0(%arg0: i32) -> (i32, i32, i32) {
    %c0_i32 = arith.constant 0 : i32
    %c0_i32_0 = arith.constant 0 : i32
    %c0_i32_1 = arith.constant 0 : i32
    return %arg0, %c0_i32, %c0_i32_0 : i32, i32, i32
  }
  func.func @transform_1(%arg0: i32) -> (i32, i32) {
    %c0_i32 = arith.constant 0 : i32
    %c0_i32_0 = arith.constant 0 : i32
    %c0_i32_1 = arith.constant 0 : i32
    return %c0_i32, %c0_i32_0 : i32, i32
  }
  func.func @transform_2(%arg0: i32) -> (i32, i32, i32) {
    %c0_i32 = arith.constant 0 : i32
    %c0_i32_0 = arith.constant 0 : i32
    %c0_i32_1 = arith.constant 0 : i32
    return %arg0, %c0_i32, %c0_i32_0 : i32, i32, i32
  }
}

</mosaic_0001>

<bundles_post_ra>
// kernel: tpu_custom_call.1
= control target key start
LH: loop header
LB: loop body
LE: loop exit
PB: predicated region body
PF: predicated region fallthrough
CT: control target
= control target key end

     0   :  { %7 = vsyncpa [#allocation3], 0  ;;  %s555_s0 = inlined_call_operand.vmem [shape: bf16[2,36,256], index: 0, kind: input, shape index: {}]   ;;  %s556_s1 = inlined_call_operand.vmem [shape: bf16[8,36], index: 1, kind: input, shape index: {}]   ;;  %s557_s2 = inlined_call_operand.hbm [shape: f32[2,8,256], index: 2, kind: output, shape index: {}]  }
   0x1   :  { %9 = vsyncpa [#allocation3 + $0x1], 0  ;;  %s452_s9 = smov 0   ;;  %s454_s10 = smov 0  }
   0x2   :  { %s456_s11 = smov 0   ;;  %s458_s12 = smov 0  }
   0x3 LB: > { %s473_s13 = sadd.s32 4294967295, %s433_s12   ;;  %s302_s14 = sadd.s32 4294967294, %s433_s12   ;;  %s433_s12 = sphi %s458_s12, %s563_s12   ;;  %s429_s11 = sphi %s456_s11, %s562_s11   ;;  %s425_s10 = sphi %s454_s10, %s561_s10   ;;  %s421_s9 = sphi %s452_s9, %s560_s9  }
   0x4   : > { %s477_s15 = sadd.s32 1, %s433_s12   ;;  %s69_s16 = sadd.s32 1, %s429_s11 }
   0x5   : > { %s66_s17 = ssub.s32 %s433_s12, %s477_s15  ;;  %p79_p0 = scmp.ne.s32.totalorder %s429_s11, %s425_s10 }
   0x6   : > { %p67_p1 = scmp.eq.s32.totalorder %s66_s17, 0  ;;  %p80_p2 = scmp.eq.s32.totalorder %s473_s13, 1 }
   0x7   : > { %p85_p3 = scmp.ne.s32.totalorder %s425_s10, %s421_s9  ;;  %p86_p4 = scmp.eq.s32.totalorder %s302_s14, 1 }
   0x8   : > { %s488_s18 = scalar_select %p67_p1, %s429_s11, %s69_s16  }
   0x9   : > { %p490_p5 = por %p80_p2, %p79_p0  ;;  %p494_p6 = por %p86_p4, %p85_p3 }
   0xa   : > { %p305_p7 = scmp.ge.s32.totalorder %s433_s12, 1  ;;  %p115_p8 = scmp.lt.s32.totalorder %s433_s12, 3 }
   0xc   : > { %p116_p9 = pnand %p305_p7, %p115_p8 }
   0xd   : > { %p137_p10 = scmp.lt.s32.totalorder (!%p116_p9), %s473_s13, 1  ;;  %v435_v0 = vmov (!%p116_p9), 0   ;;  %vm178_vm0 = vcmask (!%p116_p9), 1041408   ;;  %v143_v9 = vld [vmem:[%s556_s1] sm:$0xf] (!%p116_p9)  ;;  %vm174_vm1 = vcmask (!%p116_p9), 293888  }
   0xe   : > { %119 = sbr.rel (%p116_p9) target bundleno = 267 (0x10b), region = 28  ;;  %217 = vmatprep.mubr.bf16.mxu0 (!%p116_p9), %v435_v0  ;;  %s134_s28 = sand.u32 (!%p116_p9), 1, %s425_s10  }
   0xf   : > { %s306_s29 = sshll.u32 (!%p116_p9), %s134_s28, 4  ;;  %s321_s4 = sshll.u32 (!%p116_p9), %s473_s13, 8 }
  0x10   : > { %s136_s30 = scalar_lea.vmem (!%p116_p9), [#allocation2], %s306_s29  ;;  %s515_s7 = scalar_lea.hbm (!%p116_p9), %s557_s2, %s321_s4 }
  0x11   : > { %s243_s3 = sshll.u32 (!%p116_p9), %s136_s30, 4  ;;  %s229_s8 = scalar_lea.sflag (!%p116_p9), [#allocation3], %s134_s28  ;;  %s510_s3 = int_to_ptr.vmem [resolvable:$true] %s243_s3 }
  0x12   : > { %s371_s14 = scalar_lea.vmem (!%p116_p9), %s510_s3, 256 }
  0x13   : > { %p372_p11 = scmp.ne.s32.totalorder (!%p116_p9), %s510_s3, %s371_s14 }
  0x15   : > { %s138_s21 = scalar_select %p137_p10, %s473_s13, 1 }
  0x16   : > { %p373_p12 = pnand %p372_p11, %p490_p5  ;;  %s436_s13 = smov [#allocation2]  }
  0x17   : > { %s322_s22 = smul.u32 40, %s138_s21  ;;  %s375_s16 = sshll.u32 %s436_s13, 4  ;;  %s376_s16 = int_to_ptr.vmem [resolvable:$false] %s375_s16 }
  0x18   : > { %p374_p13 = pneg %p373_p12  ;;  %s377_s17 = scalar_lea.vmem %s376_s16, 512 }
  0x19   : > { %s141_s25 = scalar_lea.vmem %s555_s0, %s322_s22  ;;  %p378_p0 = scmp.lt.s32.totalorder %s510_s3, %s376_s16 }
  0x1a   : > { %v363_v1 = vld [vmem:[%s141_s25 + $0x4] ss:$8 sps:$4 sm:$0xff]   ;;  %v365_v2 = vld [vmem:[%s141_s25] ss:$8 sps:$4 sm:$0xff]   ;;  %v366_v3 = vld [vmem:[%s141_s25 + $0x14] ss:$8 sps:$4 sm:$0xff]   ;;  %p379_p1 = scmp.lt.s32.totalorder %s377_s17, %s371_s14 }
  0x1b   : > { %185 = vmatprep.subr.bf16.mxu0 %v363_v1  ;;  %v148_v4 = vld [vmem:[%s141_s25 + $0x20] sm:$0x33]  ;;  %v368_v5 = vld [vmem:[%s141_s25 + $0x10] ss:$8 sps:$4 sm:$0xff]  }
  0x1c   : > { %186 = vmatpush1.bf16.msra.mxu0 %v365_v2  ;;  %v313_v6 = vcombine.high %v148_v4, %v148_v4  ;;  %v312_v7 = vcombine.low %v148_v4, %v148_v4  ;;  %p380_p2 = por %p379_p1, %p378_p0 }
  0x1d   : > { %187 = vmatprep.subr.bf16.mxu0 %v366_v3 }
  0x1e   : > { %v180_v8 = vsel %vm178_vm0, %v312_v7, 0  ;;  %p381_p3 = pnand %p380_p2, %p374_p13 }
  0x20   : > { %188 = vmatpush1.bf16.msra.mxu0 %v368_v5 }
  0x21   : > { %314 = vmatprep.subr.msk.bf16.mxu0 %vm178_vm0, %v313_v6 }
  0x24   : > { %190 = vmatpush1.bf16.msra.mxu0 %v180_v8 }
  0x27   : > { %315 = vmatmul.mubr.msk.bf16.vlgmr.msra.gmra.mrb[0].mxu0 %vm174_vm1, %v143_v9 }
  0xfa   : > { %v219_v10 = vpop.f32.mrb[0].mxu0 }
  0xfb   : > { %226 = vst [vmem:[%s136_s30] sm:$0xff] %v219_v10  ;;  %v221_v11 = vpop.f32.mrb[1].mxu0 }
  0xfc   : > { %227 = vst [vmem:[%s136_s30 + $0x8] sm:$0xff] %v221_v11  ;;  %v223_v12 = vpop.f32.mrb[2].mxu0 }
  0xfd   : > { %v224_v13 = vpop.f32.mrb[3].mxu0 }
  0xfe   : > { %384 = shalt.err (!%p381_p3)
}
  0xff   : > { %s385_s21 = scalar_lea.hbm %s515_s7, 256  ;;  %s389_s24 = scalar_lea.hbm %s557_s2, 512 }
 0x100   : > { %p386_p4 = scmp.ne.s32.totalorder %s515_s7, %s385_s21  ;;  %p390_p9 = scmp.lt.u32.totalorder %s515_s7, %s557_s2 }
 0x101   : > { %p391_p10 = scmp.lt.u32.totalorder %s389_s24, %s385_s21  ;;  %p393_p12 = scmp.lt.u32.totalorder %s385_s21, %s515_s7 }
 0x102   : > { %p387_p7 = pnand %p386_p4, %p490_p5 }
 0x103   : > { %p392_p11 = por %p391_p10, %p390_p9 }
 0x104   : > { %p388_p8 = pneg %p387_p7 }
 0x105   : > { %p394_p13 = por %p393_p12, %p392_p11 }
 0x107   : > { %p395_p0 = pnand %p394_p13, %p388_p8 }
 0x109   : > { %398 = shalt.err (!%p395_p0)
}
 0x10a   : > { %323 = dma.vmem_to_hbm [thread:$0]  (%p490_p5), %s510_s3, 256, %s515_s7, %s229_s8  }
 0x10b PF: > { %p329_p1 = scmp.ge.s32.totalorder %s433_s12, 2  ;;  %s255_s27 = sand.u32 1, %s421_s9  }
 0x10c   : > { %s256_s28 = scalar_lea.sflag [#allocation3], %s255_s27 }
 0x10d   : > { %p326_p2 = pnand %p329_p1, %p494_p6 }
 0x10f   : > { %416 = dma.done.wait (!%p326_p2), %s256_s28, 256  }
 0x110   : > { %418 = vsyncadd (!%p326_p2), %s256_s28, 4294967040  ;;  %p12_p3 = scmp.ge.s32.totalorder %s477_s15, 4   ;;  %s560_s9 = smov %s425_s10 }
 0x111   : > { %s561_s10 = smov %s429_s11  ;;  %s562_s11 = smov %s488_s18 }
 0x112   : > { %s563_s12 = smov %s477_s15  ;;  %14 = sbr.rel (!%p12_p3) target bundleno = 3 (0x3), region = 63 }
 0x119   :  { %261 = vsyncpa [#allocation3], 1 }
 0x11a   :  { %263 = vsyncpa [#allocation3 + $0x1], 1 }

</bundles_post_ra>
